<compile_context>
chip_gen: v7x
topology: tpu7x:2x2x1
jax: 0.10.0
libtpu: 0.0.40
codegen_flags: <defaults>
</compile_context>

<pallas_src>
import functools

import jax
import jax.numpy as jnp
from jax.experimental import pallas as pl
from jax.experimental.pallas import tpu as pltpu

LANE = 128
SUBLANE = 8
# Safe on v7x (64 MiB VMEM per TC) and leaves plenty of headroom on v5e/v6e
# (128 MiB); big enough that tile size, not the scoped limit, is the cap.
VMEM_LIMIT_BYTES = 48 * 1024 * 1024


# ----------------------------------------------------------------------------
# Pallas kernel 1: fused MLP forward (Linear -> ReLU -> Linear).
# Grid tiles the batch only; both weight matrices + biases stay resident in
# VMEM across the grid (constant index_map), the hidden activation lives in a
# bf16 VMEM scratch.  bf16 MXU matmuls, f32 accumulation/bias.
# ----------------------------------------------------------------------------
def _mlp_fused_kernel(x_ref, w1_ref, b1_ref, w2_ref, b2_ref, o_ref, h_ref):
    # Layer 1: (tm, K1) @ (K1, H) on the MXU, f32 accumulation, +bias, ReLU.
    h = jnp.dot(x_ref[...], w1_ref[...], preferred_element_type=jnp.float32)
    h = jnp.maximum(h + b1_ref[...], 0.0)
    # Hidden activation stays in VMEM (bf16) — never written to HBM.
    h_ref[...] = h.astype(h_ref.dtype)
    # Layer 2: (tm, H) @ (H, N), f32 accumulation, +bias.
    y = jnp.dot(h_ref[...], w2_ref[...], preferred_element_type=jnp.float32)
    o_ref[...] = (y + b2_ref[...]).astype(o_ref.dtype)


def mlp_forward(x, w1, b1, w2, b2, *, tm=256):
    """NaiveRingAllReduce.forward == wrapped module forward (fused MLP)."""
    M, K1 = x.shape
    K1w, H = w1.shape
    Hw, N = w2.shape
    assert K1 == K1w and H == Hw
    assert b1.shape == (1, H) and b2.shape == (1, N)
    assert M % SUBLANE == 0 and K1 % LANE == 0 and H % LANE == 0 and N % LANE == 0, (
        "pad batch to a multiple of 8 and feature dims to multiples of 128")

    # bf16 operands for the MXU; biases / accumulator stay f32.
    x_bf = x.astype(jnp.bfloat16)
    w1_bf = w1.astype(jnp.bfloat16)
    w2_bf = w2.astype(jnp.bfloat16)
    b1_f = b1.astype(jnp.float32)
    b2_f = b2.astype(jnp.float32)

    # Batch tile: as large as requested, but keep >= 2 tiles when the batch
    # allows so the "parallel" axis can be split across both v7x TensorCores.
    tm = min(tm, M)
    if M // tm < 2 and M >= 2 * SUBLANE:
        tm = max(SUBLANE, (M // 2 // SUBLANE) * SUBLANE)
    assert M % tm == 0, "batch must be divisible by the chosen tile"

    return pl.pallas_call(
        _mlp_fused_kernel,
        out_shape=jax.ShapeDtypeStruct((M, N), jnp.float32),
        grid_spec=pltpu.PrefetchScalarGridSpec(
            num_scalar_prefetch=0,
            grid=(M // tm,),
            in_specs=[
                pl.BlockSpec((tm, K1), lambda i: (i, 0)),   # x tile
                pl.BlockSpec((K1, H), lambda i: (0, 0)),    # w1 (resident)
                pl.BlockSpec((1, H), lambda i: (0, 0)),     # b1 (resident)
                pl.BlockSpec((H, N), lambda i: (0, 0)),     # w2 (resident)
                pl.BlockSpec((1, N), lambda i: (0, 0)),     # b2 (resident)
            ],
            out_specs=pl.BlockSpec((tm, N), lambda i: (i, 0)),
            scratch_shapes=[pltpu.VMEM((tm, H), jnp.bfloat16)],
        ),
        compiler_params=pltpu.CompilerParams(
            dimension_semantics=("parallel",),
            vmem_limit_bytes=VMEM_LIMIT_BYTES),
    )(x_bf, w1_bf, b1_f, w2_bf, b2_f)


# ----------------------------------------------------------------------------
# Pallas kernel 2: single-device simulation of the backward-hook collective:
#   reduce_scatter(SUM) + all_gather + div(world_size) == mean over ranks.
# Operates directly on the 2D (world_size, numel) layout with large lane-dense
# column tiles; purely HBM-bandwidth-bound, f32 accumulation on the VPU/XLU.
# ----------------------------------------------------------------------------
def _grad_mean_kernel(g_ref, o_ref, *, inv_world_size):
    s = jnp.sum(g_ref[...].astype(jnp.float32), axis=0, keepdims=True)
    o_ref[...] = (s * inv_world_size).astype(o_ref.dtype)


def ring_allreduce_mean(grads_stacked, world_size, *,
                        vmem_budget_bytes=32 * 1024 * 1024,
                        max_tile_cols=1 << 20):
    """grads_stacked: (world_size, numel) per-rank flattened grads.

    Returns (1, numel): mean over ranks (== SUM reduce_scatter + all_gather +
    div(world_size) of the PyTorch hook; the hook's padding to a multiple of
    world_size is a mathematical no-op on the first numel entries).
    """
    ws, numel = grads_stacked.shape
    assert ws == world_size

    itemsize = jnp.dtype(grads_stacked.dtype).itemsize
    # Double-buffered input block (ws rows) + double-buffered output block.
    bytes_per_col = 2 * (ws + 1) * itemsize
    tile_cols = min(max_tile_cols, vmem_budget_bytes // bytes_per_col)
    tile_cols = min(tile_cols, pl.cdiv(numel, LANE) * LANE)
    tile_cols = max(LANE, (tile_cols // LANE) * LANE)
    # Ensure >= 2 tiles on the parallel axis when possible (v7x dual-TC).
    if pl.cdiv(numel, tile_cols) < 2 and numel > LANE:
        tile_cols = max(LANE, ((numel + 1) // 2 // LANE) * LANE)

    kernel = functools.partial(_grad_mean_kernel,
                               inv_world_size=1.0 / world_size)
    out = pl.pallas_call(
        kernel,
        out_shape=jax.ShapeDtypeStruct((1, numel), grads_stacked.dtype),
        grid_spec=pltpu.PrefetchScalarGridSpec(
            num_scalar_prefetch=0,
            grid=(pl.cdiv(numel, tile_cols),),
            in_specs=[pl.BlockSpec((ws, tile_cols), lambda c: (0, c))],
            out_specs=pl.BlockSpec((1, tile_cols), lambda c: (0, c)),
        ),
        compiler_params=pltpu.CompilerParams(
            dimension_semantics=("parallel",),
            vmem_limit_bytes=VMEM_LIMIT_BYTES),
    )(grads_stacked)
    # TODO(synk): real multi-chip ring (make_async_remote_copy, per-slot DMA
    # semaphores, get_barrier_semaphore/collective_id, bidirectional ICI with
    # compute/comm overlap, and on v7x avoiding both TCs pushing the same ring
    # direction) is not exercised here; the collective is simulated on one
    # device with stacked replicas.
    return out


if __name__ == "__main__":
    # Small but lane-aligned shapes: batch multiple of 8 (sublane), feature
    # dims multiples of 128 (lane) -> unmasked full-vreg stores, full MXU rows.
    batch, in_features, hidden, out_features = 256, 128, 256, 128
    world_size = 4  # simulated dist.get_world_size()

    key = jax.random.PRNGKey(0)
    kx, k1, k2, k3, k4, kg = jax.random.split(key, 6)

    x = jax.random.normal(kx, (batch, in_features), jnp.float32)
    # Deterministic params (simulates the rank-0 broadcast in __init__: every
    # simulated rank holds identical parameters).
    w1 = jax.random.normal(k1, (in_features, hidden), jnp.float32) * 0.05
    b1 = jax.random.normal(k2, (1, hidden), jnp.float32) * 0.05
    w2 = jax.random.normal(k3, (hidden, out_features), jnp.float32) * 0.05
    b2 = jax.random.normal(k4, (1, out_features), jnp.float32) * 0.05

    # ---- forward pass (what NaiveRingAllReduce.forward actually computes) ----
    y = jax.block_until_ready(mlp_forward(x, w1, b1, w2, b2))

    # Reference uses the same bf16 operand casts (kernel accumulates in f32).
    x_bf = x.astype(jnp.bfloat16).astype(jnp.float32)
    w1_bf = w1.astype(jnp.bfloat16).astype(jnp.float32)
    w2_bf = w2.astype(jnp.bfloat16).astype(jnp.float32)
    h_ref = jnp.maximum(x_bf @ w1_bf + b1, 0.0)
    h_ref = h_ref.astype(jnp.bfloat16).astype(jnp.float32)
    y_ref = h_ref @ w2_bf + b2
    assert jnp.allclose(y, y_ref, atol=1e-2, rtol=1e-2), "forward mismatch"

    # ---- backward-hook collective semantics (single-device simulation) ----
    numel = int(w1.size)  # 128*256 = 32768 fake per-rank gradients for w1
    per_rank_grads = jax.random.normal(kg, (world_size, numel), jnp.float32)
    avg = jax.block_until_ready(ring_allreduce_mean(per_rank_grads, world_size))
    avg_ref = jnp.mean(per_rank_grads, axis=0, keepdims=True)
    assert jnp.allclose(avg, avg_ref, atol=1e-5, rtol=1e-5), "allreduce mismatch"

    print("KERNEL_OK")
</pallas_src>

<mosaic_0001>
module attributes {stable_mosaic.version = 11 : i64} {
  func.func @_mlp_fused_kernel(%arg0: i32, %arg1: memref<128x128xbf16, #tpu.memory_space<vmem>>, %arg2: memref<128x256xbf16, #tpu.memory_space<vmem>>, %arg3: memref<1x256xf32, #tpu.memory_space<vmem>>, %arg4: memref<256x128xbf16, #tpu.memory_space<vmem>>, %arg5: memref<1x128xf32, #tpu.memory_space<vmem>>, %arg6: memref<128x128xf32, #tpu.memory_space<vmem>>, %arg7: memref<128x256xbf16, #tpu.memory_space<vmem>>) attributes {dimension_semantics = [#tpu.dimension_semantics<parallel>], iteration_bounds = array<i64: 2>, scalar_prefetch = 0 : i64, scratch_operands = 1 : i64, tpu.core_type = #tpu.core_type<tc>, window_params = [{transform_indices = @transform_0, window_bounds = array<i64: 128, 128>}, {pipeline_mode = #tpu.pipeline_mode<synchronous>, transform_indices = @transform_1, window_bounds = array<i64: 128, 256>}, {pipeline_mode = #tpu.pipeline_mode<synchronous>, transform_indices = @transform_2, window_bounds = array<i64: 1, 256>}, {pipeline_mode = #tpu.pipeline_mode<synchronous>, transform_indices = @transform_3, window_bounds = array<i64: 256, 128>}, {pipeline_mode = #tpu.pipeline_mode<synchronous>, transform_indices = @transform_4, window_bounds = array<i64: 1, 128>}, {transform_indices = @transform_5, window_bounds = array<i64: 128, 128>}]} {
    %c0 = arith.constant 0 : index
    %c0_0 = arith.constant 0 : index
    %0 = vector.load %arg1[%c0, %c0_0] : memref<128x128xbf16, #tpu.memory_space<vmem>>, vector<128x128xbf16>
    %c0_1 = arith.constant 0 : index
    %c0_2 = arith.constant 0 : index
    %1 = vector.load %arg2[%c0_1, %c0_2] : memref<128x256xbf16, #tpu.memory_space<vmem>>, vector<128x256xbf16>
    %cst = arith.constant dense<0.000000e+00> : vector<128x256xf32>
    %2 = tpu.matmul %0, %1, %cst {dimension_numbers = #tpu.dot_dimension_numbers<[1], [0], [0], [1], [0, 0, 1, 1], [], []>} : vector<128x128xbf16>, vector<128x256xbf16>, vector<128x256xf32> -> vector<128x256xf32>
    %c0_3 = arith.constant 0 : index
    %c0_4 = arith.constant 0 : index
    %3 = vector.load %arg3[%c0_3, %c0_4] : memref<1x256xf32, #tpu.memory_space<vmem>>, vector<1x256xf32>
    %4 = vector.broadcast %3 : vector<1x256xf32> to vector<128x256xf32>
    %5 = arith.addf %2, %4 : vector<128x256xf32>
    %cst_5 = arith.constant 0.000000e+00 : f32
    %6 = vector.broadcast %cst_5 : f32 to vector<128x256xf32>
    %7 = arith.maximumf %5, %6 : vector<128x256xf32>
    %8 = arith.truncf %7 : vector<128x256xf32> to vector<128x256xbf16>
    %c0_6 = arith.constant 0 : index
    %c0_7 = arith.constant 0 : index
    %9 = vector.load %arg7[%c0_6, %c0_7] : memref<128x256xbf16, #tpu.memory_space<vmem>>, vector<128x256xbf16>
    tpu.vector_store %arg7[%c0_6, %c0_7], %8 {strides = array<i32>} : memref<128x256xbf16, #tpu.memory_space<vmem>>, vector<128x256xbf16>,
    %c0_8 = arith.constant 0 : index
    %c0_9 = arith.constant 0 : index
    %10 = vector.load %arg7[%c0_8, %c0_9] : memref<128x256xbf16, #tpu.memory_space<vmem>>, vector<128x256xbf16>
    %c0_10 = arith.constant 0 : index
    %c0_11 = arith.constant 0 : index
    %11 = vector.load %arg4[%c0_10, %c0_11] : memref<256x128xbf16, #tpu.memory_space<vmem>>, vector<256x128xbf16>
    %cst_12 = arith.constant dense<0.000000e+00> : vector<128x128xf32>
    %12 = tpu.matmul %10, %11, %cst_12 {dimension_numbers = #tpu.dot_dimension_numbers<[1], [0], [0], [1], [0, 0, 1, 1], [], []>} : vector<128x256xbf16>, vector<256x128xbf16>, vector<128x128xf32> -> vector<128x128xf32>
    %c0_13 = arith.constant 0 : index
    %c0_14 = arith.constant 0 : index
    %13 = vector.load %arg5[%c0_13, %c0_14] : memref<1x128xf32, #tpu.memory_space<vmem>>, vector<1x128xf32>
    %14 = vector.broadcast %13 : vector<1x128xf32> to vector<128x128xf32>
    %15 = arith.addf %12, %14 : vector<128x128xf32>
    %c0_15 = arith.constant 0 : index
    %c0_16 = arith.constant 0 : index
    %16 = vector.load %arg6[%c0_15, %c0_16] : memref<128x128xf32, #tpu.memory_space<vmem>>, vector<128x128xf32>
    tpu.vector_store %arg6[%c0_15, %c0_16], %15 {strides = array<i32>} : memref<128x128xf32, #tpu.memory_space<vmem>>, vector<128x128xf32>,
    return
  }
  func.func @transform_0(%arg0: i32) -> (i32, i32) {
    %c0_i32 = arith.constant 0 : i32
    %c0_i32_0 = arith.constant 0 : i32
    return %arg0, %c0_i32 : i32, i32
  }
  func.func @transform_1(%arg0: i32) -> (i32, i32) {
    %c0_i32 = arith.constant 0 : i32
    %c0_i32_0 = arith.constant 0 : i32
    %c0_i32_1 = arith.constant 0 : i32
    return %c0_i32, %c0_i32_0 : i32, i32
  }
  func.func @transform_2(%arg0: i32) -> (i32, i32) {
    %c0_i32 = arith.constant 0 : i32
    %c0_i32_0 = arith.constant 0 : i32
    %c0_i32_1 = arith.constant 0 : i32
    return %c0_i32, %c0_i32_0 : i32, i32
  }
  func.func @transform_3(%arg0: i32) -> (i32, i32) {
    %c0_i32 = arith.constant 0 : i32
    %c0_i32_0 = arith.constant 0 : i32
    %c0_i32_1 = arith.constant 0 : i32
    return %c0_i32, %c0_i32_0 : i32, i32
  }
  func.func @transform_4(%arg0: i32) -> (i32, i32) {
    %c0_i32 = arith.constant 0 : i32
    %c0_i32_0 = arith.constant 0 : i32
    %c0_i32_1 = arith.constant 0 : i32
    return %c0_i32, %c0_i32_0 : i32, i32
  }
  func.func @transform_5(%arg0: i32) -> (i32, i32) {
    %c0_i32 = arith.constant 0 : i32
    %c0_i32_0 = arith.constant 0 : i32
    return %arg0, %c0_i32 : i32, i32
  }
}

</mosaic_0001>

<bundles_post_ra>
// kernel: tpu_custom_call.1
= control target key start
LH: loop header
LB: loop body
LE: loop exit
PB: predicated region body
PF: predicated region fallthrough
CT: control target
= control target key end

     0   :  { %10 = vsyncpa [#allocation4], 0  ;;  %s1778_s0 = inlined_call_operand.hbm [shape: bf16[256,128], index: 0, kind: input, shape index: {}]   ;;  %s1779_s1 = inlined_call_operand.hbm [shape: bf16[128,256], index: 1, kind: input, shape index: {}]   ;;  %s1780_s2 = inlined_call_operand.vmem [shape: f32[1,256], index: 2, kind: input, shape index: {}]   ;;  %s1781_s3 = inlined_call_operand.hbm [shape: bf16[256,128], index: 3, kind: input, shape index: {}]   ;;  %s1782_s4 = inlined_call_operand.vmem [shape: f32[1,128], index: 4, kind: input, shape index: {}]   ;;  %s1783_s5 = inlined_call_operand.hbm [shape: f32[256,128], index: 5, kind: output, shape index: {}]  }
   0x1   :  { %12 = vsyncpa [#allocation4 + $0x1], 0 }
   0x2   :  { %13 = vsyncpa [#allocation7], 0 }
   0x3   :  { %14 = vsyncpa [#allocation5], 0 }
   0x4   :  { %16 = vsyncpa [#allocation5 + $0x1], 0  ;;  %s1440_s18 = smov 0   ;;  %s1442_s19 = smov 0  }
   0x5   :  { %s1444_s20 = smov 0   ;;  %s1446_s21 = smov 0  }
   0x6 LB: > { %s1461_s22 = sadd.s32 4294967295, %s1397_s21   ;;  %s994_s23 = sadd.s32 4294967294, %s1397_s21   ;;  %s1397_s21 = sphi %s1446_s21, %s1803_s21   ;;  %s1393_s20 = sphi %s1444_s20, %s1802_s20   ;;  %s1389_s19 = sphi %s1442_s19, %s1801_s19   ;;  %s1385_s18 = sphi %s1440_s18, %s1800_s18  }
   0x7   : > { %p42_p0 = scmp.ne.s32.totalorder %s1389_s19, %s1385_s18  ;;  %p1784_p1 = scmp.eq.s32.totalorder %s1461_s22, 0 }
   0x8   : > { %p156_p3 = scmp.eq.s32.totalorder %s994_s23, 1  ;;  %p995_p5 = scmp.ge.s32.totalorder %s1397_s21, 1 }
   0x9   : > { %p1470_p4 = por %p1784_p1, %p42_p0  ;;  %p163_p7 = scmp.lt.s32.totalorder %s1397_s21, 3 }
   0xa   : > { %p1475_p6 = por %p156_p3, %p42_p0  ;;  %s1399_s27 = smov [#allocation6]  }
   0xb   : > { %s1787_s24 = scalar_select %p1470_p4, 1, 0 }
   0xc   : > { %s1788_s25 = scalar_select %p1475_p6, 1, 0 }
   0xd   : > { %p1480_p8 = pnand %p995_p5, %p163_p7  ;;  %s175_s28 = sshll.u32 %s1399_s27, 4  ;;  %s1484_s28 = int_to_ptr.vmem [resolvable:$true] %s175_s28 }
   0xe   : > { %s1400_s30 = smov [#allocation8]   ;;  %s1241_s9 = scalar_lea.hbm %s1779_s1, 2048 }
   0xf   : > { %p1131_p9 = pneg %p1480_p8  ;;  %s191_s6 = sshll.u32 %s1400_s30, 4  ;;  %s1495_s6 = int_to_ptr.vmem [resolvable:$true] %s191_s6 }
  0x10   : > { %p1242_p12 = scmp.ne.s32.totalorder %s1779_s1, %s1241_s9  ;;  %p1248_p5 = scmp.lt.u32.totalorder %s1241_s9, %s1779_s1 }
  0x11   : > { %p1491_p11 = pnand %p1131_p9, %p1784_p1 }
  0x13   : > { %p1243_p13 = pneg %p1491_p11 }
  0x15   : > { %p1244_p0 = pnand %p1243_p13, %p1242_p12 }
  0x17   : > { %p1245_p3 = pneg %p1244_p0 }
  0x19   : > { %p1250_p7 = pnand %p1248_p5, %p1245_p3 }
  0x1b   : > { %1253 = shalt.err (!%p1250_p7)
}
  0x1c   : > { %s1254_s14 = scalar_lea.vmem %s1484_s28, 2048  ;;  %p1262_p2 = scmp.lt.s32.totalorder %s1484_s28, %s1484_s28 }
  0x1d   : > { %p1255_p9 = scmp.ne.s32.totalorder %s1484_s28, %s1254_s14  ;;  %p1263_p12 = scmp.lt.s32.totalorder %s1254_s14, %s1254_s14 }
  0x1f   : > { %p1257_p10 = pnand %p1255_p9, %p1243_p13  ;;  %p1264_p0 = por %p1263_p12, %p1262_p2 }
  0x21   : > { %p1258_p1 = pneg %p1257_p10 }
  0x23   : > { %p1265_p6 = pnand %p1264_p0, %p1258_p1 }
  0x25   : > { %1268 = shalt.err (!%p1265_p6)
}
  0x26   : > { %s1401_s15 = smov 128   ;;  %s1402_s16 = smov 8  }
  0x27   : > { %1134 = dma.hbm_to_vmem [thread:$0]  (!%p1491_p11), %s1779_s1, 2048, %s1484_s28, [#allocation7], %s1401_s15, %s1401_s15, %s1402_s16  }
  0x28   : > { %s1269_s7 = scalar_lea.hbm %s1781_s3, 2048 }
  0x29   : > { %p1270_p2 = scmp.ne.s32.totalorder %s1781_s3, %s1269_s7  ;;  %p1276_p10 = scmp.lt.u32.totalorder %s1269_s7, %s1781_s3 }
  0x2b   : > { %p1272_p1 = pnand %p1270_p2, %p1243_p13 }
  0x2d   : > { %p1273_p6 = pneg %p1272_p1 }
  0x2f   : > { %p1278_p3 = pnand %p1276_p10, %p1273_p6 }
  0x31   : > { %1281 = shalt.err (!%p1278_p3)
}
  0x32   : > { %s1282_s28 = scalar_lea.vmem %s1495_s6, 2048  ;;  %p1290_p12 = scmp.lt.s32.totalorder %s1495_s6, %s1495_s6 }
  0x33   : > { %p1283_p5 = scmp.ne.s32.totalorder %s1495_s6, %s1282_s28  ;;  %p1291_p0 = scmp.lt.s32.totalorder %s1282_s28, %s1282_s28 }
  0x35   : > { %p1285_p7 = pnand %p1283_p5, %p1243_p13  ;;  %p1292_p2 = por %p1291_p0, %p1290_p12 }
  0x37   : > { %p1286_p9 = pneg %p1285_p7 }
  0x39   : > { %p1293_p1 = pnand %p1292_p2, %p1286_p9 }
  0x3b   : > { %1296 = shalt.err (!%p1293_p1)
}
  0x3c   : > { %s1403_s12 = smov 64   ;;  %s1404_s13 = smov 4  }
  0x3d   : > { %1137 = dma.hbm_to_vmem [thread:$0]  (!%p1491_p11), %s1781_s3, 2048, %s1495_s6, [#allocation7], %s1403_s12, %s1403_s12, %s1404_s13  }
  0x3e   : > { %s1553_s16 = sadd.s32 1, %s1397_s21   ;;  %s29_s23 = sadd.s32 1, %s1393_s20 }
  0x3f   : > { %s26_s17 = ssub.s32 %s1397_s21, %s1553_s16  ;;  %p36_p6 = scmp.ne.s32.totalorder %s1393_s20, %s1389_s19 }
  0x40   : > { %p27_p13 = scmp.eq.s32.totalorder %s26_s17, 0  ;;  %p37_p10 = scmp.eq.s32.totalorder %s1397_s21, 0 }
  0x41   : > { %p1791_p5 = scmp.eq.s32.totalorder %s1461_s22, 1  ;;  %p1148_p9 = scmp.lt.s32.totalorder %s1397_s21, 2 }
  0x42   : > { %s1562_s27 = scalar_select %p27_p13, %s1393_s20, %s29_s23  }
  0x43   : > { %p38_p3 = por %p37_p10, %p36_p6  ;;  %p1566_p7 = por %p1791_p5, %p36_p6 }
  0x44   : > { %s208_s30 = sand.u32 1, %s1393_s20   ;;  %s1053_s6 = sshll.u32 %s1397_s21, 10 }
  0x45   : > { %s1792_s29 = scalar_select %p1566_p7, 1, 0 }
  0x46   : > { %s999_s7 = sshll.u32 %s208_s30, 6  ;;  %s1576_s10 = scalar_lea.hbm %s1778_s0, %s1053_s6 }
  0x47   : > { %s212_s11 = scalar_lea.vmem [#allocation3], %s999_s7  ;;  %p1580_p11 = pnand %p1148_p9, %p38_p3 }
  0x48   : > { %s219_s28 = sshll.u32 %s212_s11, 4  ;;  %s1584_s15 = scalar_lea.sflag [#allocation4], %s208_s30  ;;  %s1578_s28 = int_to_ptr.vmem [resolvable:$true] %s219_s28 }
  0x49   : > { %s1297_s17 = scalar_lea.hbm %s1576_s10, 1024  ;;  %p1299_p0 = pneg %p1580_p11 }
  0x4a   : > { %p1298_p12 = scmp.ne.s32.totalorder %s1576_s10, %s1297_s17  ;;  %s1302_s6 = scalar_lea.hbm %s1778_s0, 2048 }
  0x4b   : > { %p1303_p13 = scmp.lt.u32.totalorder %s1576_s10, %s1778_s0  ;;  %p1304_p6 = scmp.lt.u32.totalorder %s1302_s6, %s1297_s17 }
  0x4c   : > { %p1300_p2 = pnand %p1299_p0, %p1298_p12  ;;  %p1306_p3 = scmp.lt.u32.totalorder %s1297_s17, %s1576_s10 }
  0x4d   : > { %p1305_p10 = por %p1304_p6, %p1303_p13 }
  0x4e   : > { %p1301_p1 = pneg %p1300_p2 }
  0x4f   : > { %p1307_p5 = por %p1306_p3, %p1305_p10 }
  0x51   : > { %p1308_p9 = pnand %p1307_p5, %p1301_p1 }
  0x53   : > { %1311 = shalt.err (!%p1308_p9)
}
  0x54   : > { %s1312_s30 = scalar_lea.vmem %s1578_s28, 1024  ;;  %s1405_s11 = smov [#allocation3]  }
  0x55   : > { %p1313_p12 = scmp.ne.s32.totalorder %s1578_s28, %s1312_s30  ;;  %s1317_s23 = sshll.u32 %s1405_s11, 4  ;;  %s1318_s23 = int_to_ptr.vmem [resolvable:$false] %s1317_s23 }
  0x56   : > { %s1319_s7 = scalar_lea.vmem %s1318_s23, 2048  ;;  %p1320_p4 = scmp.lt.s32.totalorder %s1578_s28, %s1318_s23 }
  0x57   : > { %p1315_p2 = pnand %p1313_p12, %p1299_p0  ;;  %p1321_p13 = scmp.lt.s32.totalorder %s1319_s7, %s1312_s30 }
  0x59   : > { %p1316_p7 = pneg %p1315_p2  ;;  %p1322_p6 = por %p1321_p13, %p1320_p4 }
  0x5b   : > { %p1323_p10 = pnand %p1322_p6, %p1316_p7 }
  0x5d   : > { %1326 = shalt.err (!%p1323_p10)
}
  0x5e   : > { %1141 = dma.hbm_to_vmem [thread:$0]  (!%p1580_p11), %s1576_s10, 1024, %s1578_s28, %s1584_s15, %s1403_s12, %s1403_s12, %s1404_s13  }
  0x5f   : > { %231 = sbr.rel (%p1480_p8) target bundleno = 651 (0x28b), region = 40  ;;  %s1618_s17 = sand.u32 (!%p1480_p8), 1, %s1389_s19  }
  0x60   : > { %s1003_s6 = sshll.u32 (!%p1480_p8), %s1618_s17, 6  ;;  %s234_s8 = scalar_lea.sflag (!%p1480_p8), [#allocation4], %s1618_s17 }
  0x61   : > { %s1622_s9 = scalar_lea.vmem (!%p1480_p8), [#allocation3], %s1003_s6  ;;  %p1794_p4 = scmp.ne.s32.totalorder (!%p1480_p8), %s1787_s24, 0 }
  0x66   : > { %1372 = dma.done.wait (%p1794_p4), %s234_s8, 1024  }
  0x67   : > { %1374 = vsyncadd (%p1794_p4), %s234_s8, 4294966272  ;;  %p1795_p7 = scmp.eq.s32.totalorder %s1461_s22, 0 }
  0x69   : > { %1376 = dma.done.wait (%p1795_p7), [#allocation7], 4096   ;;  %p1796_p8 = pmov %p1795_p7 }
  0x6a   : > { %v1406_v0 = vmov 0   ;;  %v1193_v1 = vld [vmem:[#allocation6 + $0x4] ss:$8 sps:$4 sm:$0xff]   ;;  %v1195_v2 = vld [vmem:[#allocation6] ss:$8 sps:$4 sm:$0xff]   ;;  %v1229_v19 = vld [vmem:[#allocation8 + $0x50] sm:$0xff]   ;;  %v309_v41 = vlaneseq }
  0x6b   : > { %1378 = vsyncadd (%p1796_p8), [#allocation7], 4294963200  ;;  %479 = vmatprep.mubr.bf16.mxu0 %v1406_v0  ;;  %447 = vmatprep.subr.bf16.mxu0 %v1193_v1  ;;  %v1196_v3 = vld [vmem:[#allocation6 + $0x14] ss:$8 sps:$4 sm:$0xff]   ;;  %v1198_v4 = vld [vmem:[#allocation6 + $0x10] ss:$8 sps:$4 sm:$0xff]  }
  0x6c   : > { %448 = vmatpush1.bf16.msra.mxu0 %v1195_v2  ;;  %v1199_v5 = vld [vmem:[#allocation6 + $0x24] ss:$8 sps:$4 sm:$0xff]   ;;  %v1201_v6 = vld [vmem:[#allocation6 + $0x20] ss:$8 sps:$4 sm:$0xff]   ;;  %v1202_v7 = vld [vmem:[#allocation6 + $0x34] ss:$8 sps:$4 sm:$0xff]  }
  0x6d   : > { %449 = vmatprep.subr.bf16.mxu0 %v1196_v3  ;;  %v1204_v8 = vld [vmem:[#allocation6 + $0x30] ss:$8 sps:$4 sm:$0xff]   ;;  %v1205_v9 = vld [vmem:[#allocation6 + $0x44] ss:$8 sps:$4 sm:$0xff]   ;;  %v1207_v10 = vld [vmem:[#allocation6 + $0x40] ss:$8 sps:$4 sm:$0xff]  }
  0x6e   : > { %v1208_v11 = vld [vmem:[#allocation6 + $0x54] ss:$8 sps:$4 sm:$0xff]   ;;  %v1210_v12 = vld [vmem:[#allocation6 + $0x50] ss:$8 sps:$4 sm:$0xff]   ;;  %v1211_v13 = vld [vmem:[#allocation6 + $0x64] ss:$8 sps:$4 sm:$0xff]  }
  0x6f   : > { %v1225_v14 = vld [vmem:[#allocation8 + $0x40] sm:$0xff]   ;;  %v1227_v17 = vld [vmem:[#allocation8 + $0x48] sm:$0xff]   ;;  %v1214_v20 = vld [vmem:[#allocation6 + $0x74] ss:$8 sps:$4 sm:$0xff]   ;;  %v310_v42 = vshrl.u32 %v309_v41, 7  ;;  %s1006_s12 = sshll.u32 %s1618_s17, 7 }
  0x70   : > { %450 = vmatpush1.bf16.msra.mxu0 %v1198_v4  ;;  %v1226_v15 = vld [vmem:[#allocation8] sm:$0xff]   ;;  %1055 = vmatprep.subr.bf16.mxu1 %v1225_v14  ;;  %v1228_v18 = vld [vmem:[#allocation8 + $0x8] sm:$0xff]   ;;  %v1216_v21 = vld [vmem:[#allocation6 + $0x70] ss:$8 sps:$4 sm:$0xff]   ;;  %s1694_s28 = scalar_lea.vmem [#allocation9], %s1006_s12  ;;  %s1054_s14 = sshll.u32 %s1461_s22, 11 }
  0x71   : > { %451 = vmatprep.subr.bf16.mxu0 %v1199_v5  ;;  %v1213_v16 = vld [vmem:[#allocation6 + $0x60] ss:$8 sps:$4 sm:$0xff]   ;;  %1056 = vmatpush3.bf16.msra.mxu1 %v1226_v15  ;;  %v1230_v22 = vld [vmem:[#allocation8 + $0x10] sm:$0xff]   ;;  %v1231_v23 = vld [vmem:[#allocation8 + $0x58] sm:$0xff]   ;;  %v311_v43 = vsub.s32 0, %v310_v42  ;;  %v315_v45 = vsub.s32 1, %v310_v42  ;;  %s1729_s23 = scalar_lea.hbm %s1783_s5, %s1054_s14 }
  0x72   : > { %1057 = vmatprep.subr.bf16.mxu1 %v1227_v17  ;;  %v1217_v24 = vld [vmem:[%s1622_s9] sm:$0xff]   ;;  %v1232_v25 = vld [vmem:[#allocation8 + $0x18] sm:$0xff]   ;;  %v1235_v28 = vld [vmem:[#allocation8 + $0x68] sm:$0xff]   ;;  %s902_s15 = sshll.u32 %s1694_s28, 4  ;;  %s889_s22 = scalar_lea.sflag [#allocation5], %s1618_s17  ;;  %s1731_s15 = int_to_ptr.vmem [resolvable:$true] %s902_s15 }
  0x73   : > { %v1233_v26 = vld [vmem:[#allocation8 + $0x60] sm:$0xff]   ;;  %v1218_v29 = vld [vmem:[%s1622_s9 + $0x8] sm:$0xff]   ;;  %v1219_v30 = vld [vmem:[%s1622_s9 + $0x10] sm:$0xff]   ;;  %s1327_s7 = scalar_lea.vmem %s1731_s15, 2048  ;;  %p1797_p0 = scmp.ne.s32.totalorder %s1792_s29, 0 }
  0x74   : > { %452 = vmatpush1.bf16.msra.mxu0 %v1201_v6  ;;  %v1234_v27 = vld [vmem:[#allocation8 + $0x20] sm:$0xff]   ;;  %v1220_v31 = vld [vmem:[%s1622_s9 + $0x18] sm:$0xff]   ;;  %v1222_v33 = vld [vmem:[%s1622_s9 + $0x28] sm:$0xff]   ;;  %p1328_p11 = scmp.ne.s32.totalorder %s1731_s15, %s1327_s7  ;;  %s1407_s6 = smov [#allocation9]  }
  0x75   : > { %453 = vmatprep.subr.bf16.mxu0 %v1202_v7  ;;  %1058 = vmatpush3.bf16.msra.mxu1 %v1228_v18  ;;  %v1221_v32 = vld [vmem:[%s1622_s9 + $0x20] sm:$0xff]   ;;  %v1223_v34 = vld [vmem:[%s1622_s9 + $0x30] sm:$0xff]   ;;  %v1224_v35 = vld [vmem:[%s1622_s9 + $0x38] sm:$0xff]   ;;  %s1331_s8 = sshll.u32 %s1407_s6, 4  ;;  %s1332_s8 = int_to_ptr.vmem [resolvable:$false] %s1331_s8 }
  0x76   : > { %1059 = vmatprep.subr.bf16.mxu1 %v1229_v19  ;;  %v1236_v36 = vld [vmem:[#allocation8 + $0x28] sm:$0xff]   ;;  %v1237_v37 = vld [vmem:[#allocation8 + $0x70] sm:$0xff]   ;;  %v1239_v39 = vld [vmem:[#allocation8 + $0x78] sm:$0xff]   ;;  %p1329_p1 = pnand %p1328_p11, %p1797_p0  ;;  %s1333_s9 = scalar_lea.vmem %s1332_s8, 4096 }
  0x77   : > { %v1238_v38 = vld [vmem:[#allocation8 + $0x30] sm:$0xff]   ;;  %v1240_v40 = vld [vmem:[#allocation8 + $0x38] sm:$0xff]   ;;  %v307_v44 = vld [vmem:[%s1780_s2] sm:$0x3]  ;;  %p1334_p5 = scmp.lt.s32.totalorder %s1731_s15, %s1332_s8  ;;  %p1335_p9 = scmp.lt.s32.totalorder %s1333_s9, %s1327_s7 }
  0x78   : > { %454 = vmatpush1.bf16.msra.mxu0 %v1204_v8  ;;  %v1651_v46 = vrot.slane %v307_v44, %v311_v43  ;;  %v1653_v47 = vrot.slane %v307_v44, %v315_v45  ;;  %p1330_p3 = pneg %p1329_p1 }
  0x79   : > { %455 = vmatprep.subr.bf16.mxu0 %v1205_v9  ;;  %1060 = vmatpush3.bf16.msra.mxu1 %v1230_v22  ;;  %p1336_p12 = por %p1335_p9, %p1334_p5 }
  0x7a   : > { %1061 = vmatprep.subr.bf16.mxu1 %v1231_v23 }
  0x7b   : > { %p1337_p2 = pnand %p1336_p12, %p1330_p3 }
  0x7c   : > { %456 = vmatpush1.bf16.msra.mxu0 %v1207_v10 }
  0x7d   : > { %457 = vmatprep.subr.bf16.mxu0 %v1208_v11  ;;  %1062 = vmatpush3.bf16.msra.mxu1 %v1232_v25 }
  0x7e   : > { %1063 = vmatprep.subr.bf16.mxu1 %v1233_v26 }
  0x80   : > { %458 = vmatpush1.bf16.msra.mxu0 %v1210_v12 }
  0x81   : > { %459 = vmatprep.subr.bf16.mxu0 %v1211_v13  ;;  %1064 = vmatpush3.bf16.msra.mxu1 %v1234_v27 }
  0x82   : > { %1065 = vmatprep.subr.bf16.mxu1 %v1235_v28 }
  0x84   : > { %460 = vmatpush1.bf16.msra.mxu0 %v1213_v16 }
  0x85   : > { %461 = vmatprep.subr.bf16.mxu0 %v1214_v20  ;;  %1066 = vmatpush3.bf16.msra.mxu1 %v1236_v36 }
  0x86   : > { %1067 = vmatprep.subr.bf16.mxu1 %v1237_v37 }
  0x88   : > { %462 = vmatpush1.bf16.msra.mxu0 %v1216_v21 }
  0x89   : > { %1068 = vmatpush3.bf16.msra.mxu1 %v1238_v38 }
  0x8a   : > { %1069 = vmatprep.subr.bf16.mxu1 %v1239_v39 }
  0x8b   : > { %480 = vmatmul.mubr.bf16.vlgmr.msra.gmra.mrb[0].mxu0 %v1217_v24 }
  0x8c   : > { %489 = vmatprep.mubr.bf16.mxu0 %v1406_v0 }
  0x8d   : > { %1070 = vmatpush3.bf16.msra.mxu1 %v1240_v40 }
  0x93   : > { %490 = vmatmul.mubr.bf16.gmra.mrb[4].mxu0 %v1218_v29 }
  0x94   : > { %499 = vmatprep.mubr.bf16.mxu0 %v1406_v0 }
  0x9b   : > { %500 = vmatmul.mubr.bf16.gmra.mrb[8].mxu0 %v1219_v30 }
  0x9c   : > { %509 = vmatprep.mubr.bf16.mxu0 %v1406_v0 }
  0xa3   : > { %510 = vmatmul.mubr.bf16.gmra.mrb[12].mxu0 %v1220_v31 }
  0xa4   : > { %519 = vmatprep.mubr.bf16.mxu0 %v1406_v0 }
  0xab   : > { %520 = vmatmul.mubr.bf16.gmra.mrb[16].mxu0 %v1221_v32 }
  0xac   : > { %529 = vmatprep.mubr.bf16.mxu0 %v1406_v0 }
  0xb3   : > { %530 = vmatmul.mubr.bf16.gmra.mrb[20].mxu0 %v1222_v33 }
  0xb4   : > { %539 = vmatprep.mubr.bf16.mxu0 %v1406_v0 }
  0xbb   : > { %540 = vmatmul.mubr.bf16.gmra.mrb[24].mxu0 %v1223_v34 }
  0xbc   : > { %549 = vmatprep.mubr.bf16.mxu0 %v1406_v0 }
  0xc3   : > { %550 = vmatmul.mubr.bf16.gmra.mrb[28].mxu0 %v1224_v35 }
 0x15e   : > { %v481_v48 = vpop.f32.mrb[0].mxu0 }
 0x15f   : > { %v482_v49 = vadd.f32 %v481_v48, %v1651_v46  ;;  %v483_v50 = vpop.f32.mrb[1].mxu0 }
 0x160   : > { %v484_v51 = vadd.f32 %v483_v50, %v1653_v47  ;;  %v485_v52 = vpop.f32.mrb[2].mxu0 }
 0x161   : > { %v486_v53 = vadd.f32 %v485_v52, %v1651_v46  ;;  %v487_v54 = vpop.f32.mrb[3].mxu0  ;;  %v560_v56 = vmax.f32 %v482_v49, 0.0 }
 0x162   : > { %v488_v55 = vadd.f32 %v487_v54, %v1653_v47  ;;  %v561_v58 = vmax.f32 %v484_v51, 0.0 }
 0x163   : > { %v562_v57 = vmax.f32 %v486_v53, 0.0 }
 0x164   : > { %v563_v59 = vmax.f32 %v488_v55, 0.0 }
 0x165   : > { %v592_v60 = vpack.c.bf16 %v562_v57, %v560_v56 }
 0x166   : > { %v491_v61 = vpop.f32.mrb[4].mxu0  ;;  %v593_v62 = vpack.c.bf16 %v563_v59, %v561_v58 }
 0x167   : > { %v492_v63 = vadd.f32 %v491_v61, %v1651_v46  ;;  %v493_v0 = vpop.f32.mrb[5].mxu0 }
 0x168   : > { %v494_v1 = vadd.f32 %v493_v0, %v1653_v47  ;;  %v495_v2 = vpop.f32.mrb[6].mxu0  ;;  %807 = vmatprep.mubr.bf16.mxu1 %v593_v62 }
 0x169   : > { %v496_v3 = vadd.f32 %v495_v2, %v1651_v46  ;;  %v497_v4 = vpop.f32.mrb[7].mxu0  ;;  %808 = vmatmul.mubr.bf16.vlgmr.msra.gmra.mrb[0].mxu1 %v592_v60  ;;  %v564_v6 = vmax.f32 %v492_v63, 0.0 }
 0x16a   : > { %v498_v5 = vadd.f32 %v497_v4, %v1653_v47  ;;  %v565_v8 = vmax.f32 %v494_v1, 0.0 }
 0x16b   : > { %v566_v7 = vmax.f32 %v496_v3, 0.0 }
 0x16c   : > { %v567_v9 = vmax.f32 %v498_v5, 0.0 }
 0x16d   : > { %v594_v10 = vpack.c.bf16 %v566_v7, %v564_v6 }
 0x16e   : > { %v595_v11 = vpack.c.bf16 %v567_v9, %v565_v8  ;;  %v501_v12 = vpop.f32.mrb[8].mxu0 }
 0x16f   : > { %v502_v13 = vadd.f32 %v501_v12, %v1651_v46  ;;  %v503_v14 = vpop.f32.mrb[9].mxu0 }
 0x170   : > { %v504_v15 = vadd.f32 %v503_v14, %v1653_v47  ;;  %v505_v16 = vpop.f32.mrb[10].mxu0  ;;  %815 = vmatprep.mubr.bf16.mxu1 %v595_v11 }
 0x171   : > { %v506_v17 = vadd.f32 %v505_v16, %v1651_v46  ;;  %v507_v18 = vpop.f32.mrb[11].mxu0  ;;  %816 = vmatmul.mubr.bf16.gmra.mrb[4].mxu1 %v594_v10  ;;  %v568_v20 = vmax.f32 %v502_v13, 0.0 }
 0x172   : > { %v508_v19 = vadd.f32 %v507_v18, %v1653_v47  ;;  %v569_v22 = vmax.f32 %v504_v15, 0.0 }
 0x173   : > { %v570_v21 = vmax.f32 %v506_v17, 0.0 }
 0x174   : > { %v571_v23 = vmax.f32 %v508_v19, 0.0 }
 0x175   : > { %v596_v24 = vpack.c.bf16 %v570_v21, %v568_v20 }
 0x176   : > { %v597_v25 = vpack.c.bf16 %v571_v23, %v569_v22  ;;  %v511_v26 = vpop.f32.mrb[12].mxu0 }
 0x177   : > { %v512_v27 = vadd.f32 %v511_v26, %v1651_v46  ;;  %v513_v28 = vpop.f32.mrb[13].mxu0 }
 0x178   : > { %v514_v29 = vadd.f32 %v513_v28, %v1653_v47  ;;  %v515_v30 = vpop.f32.mrb[14].mxu0  ;;  %823 = vmatprep.mubr.bf16.mxu1 %v597_v25 }
 0x179   : > { %v516_v31 = vadd.f32 %v515_v30, %v1651_v46  ;;  %v517_v32 = vpop.f32.mrb[15].mxu0  ;;  %824 = vmatmul.mubr.bf16.gmra.mrb[8].mxu1 %v596_v24  ;;  %v572_v34 = vmax.f32 %v512_v27, 0.0 }
 0x17a   : > { %v518_v33 = vadd.f32 %v517_v32, %v1653_v47  ;;  %v573_v36 = vmax.f32 %v514_v29, 0.0 }
 0x17b   : > { %v574_v35 = vmax.f32 %v516_v31, 0.0 }
 0x17c   : > { %v575_v37 = vmax.f32 %v518_v33, 0.0 }
 0x17d   : > { %v598_v38 = vpack.c.bf16 %v574_v35, %v572_v34  ;;  %v1691_v35 = vld [vmem:[%s1782_s4] ss:$0 sm:$0xff] }
 0x17e   : > { %v599_v39 = vpack.c.bf16 %v575_v37, %v573_v36  ;;  %v521_v40 = vpop.f32.mrb[16].mxu0 }
 0x17f   : > { %v522_v41 = vadd.f32 %v521_v40, %v1651_v46  ;;  %v523_v42 = vpop.f32.mrb[17].mxu0 }
 0x180   : > { %v524_v43 = vadd.f32 %v523_v42, %v1653_v47  ;;  %v525_v44 = vpop.f32.mrb[18].mxu0  ;;  %831 = vmatprep.mubr.bf16.mxu1 %v599_v39 }
 0x181   : > { %v526_v45 = vadd.f32 %v525_v44, %v1651_v46  ;;  %v527_v48 = vpop.f32.mrb[19].mxu0  ;;  %832 = vmatmul.mubr.bf16.gmra.mrb[12].mxu1 %v598_v38  ;;  %v576_v50 = vmax.f32 %v522_v41, 0.0 }
 0x182   : > { %v528_v49 = vadd.f32 %v527_v48, %v1653_v47  ;;  %v577_v52 = vmax.f32 %v524_v43, 0.0 }
 0x183   : > { %v578_v51 = vmax.f32 %v526_v45, 0.0 }
 0x184   : > { %v579_v53 = vmax.f32 %v528_v49, 0.0 }
 0x185   : > { %v600_v54 = vpack.c.bf16 %v578_v51, %v576_v50 }
 0x186   : > { %v601_v55 = vpack.c.bf16 %v579_v53, %v577_v52  ;;  %v531_v56 = vpop.f32.mrb[20].mxu0 }
 0x187   : > { %v532_v57 = vadd.f32 %v531_v56, %v1651_v46  ;;  %v533_v58 = vpop.f32.mrb[21].mxu0 }
 0x188   : > { %v534_v59 = vadd.f32 %v533_v58, %v1653_v47  ;;  %v535_v60 = vpop.f32.mrb[22].mxu0  ;;  %839 = vmatprep.mubr.bf16.mxu1 %v601_v55 }
 0x189   : > { %v536_v61 = vadd.f32 %v535_v60, %v1651_v46  ;;  %v537_v62 = vpop.f32.mrb[23].mxu0  ;;  %840 = vmatmul.mubr.bf16.gmra.mrb[16].mxu1 %v600_v54  ;;  %v580_v0 = vmax.f32 %v532_v57, 0.0 }
 0x18a   : > { %v538_v63 = vadd.f32 %v537_v62, %v1653_v47  ;;  %v581_v2 = vmax.f32 %v534_v59, 0.0 }
 0x18b   : > { %v582_v1 = vmax.f32 %v536_v61, 0.0 }
 0x18c   : > { %v583_v3 = vmax.f32 %v538_v63, 0.0 }
 0x18d   : > { %v602_v4 = vpack.c.bf16 %v582_v1, %v580_v0 }
 0x18e   : > { %v603_v5 = vpack.c.bf16 %v583_v3, %v581_v2  ;;  %v541_v6 = vpop.f32.mrb[24].mxu0 }
 0x18f   : > { %v542_v7 = vadd.f32 %v541_v6, %v1651_v46  ;;  %v543_v8 = vpop.f32.mrb[25].mxu0 }
 0x190   : > { %v544_v9 = vadd.f32 %v543_v8, %v1653_v47  ;;  %v545_v10 = vpop.f32.mrb[26].mxu0  ;;  %847 = vmatprep.mubr.bf16.mxu1 %v603_v5 }
 0x191   : > { %v546_v11 = vadd.f32 %v545_v10, %v1651_v46  ;;  %v547_v12 = vpop.f32.mrb[27].mxu0  ;;  %848 = vmatmul.mubr.bf16.gmra.mrb[20].mxu1 %v602_v4  ;;  %v584_v14 = vmax.f32 %v542_v7, 0.0 }
 0x192   : > { %v548_v13 = vadd.f32 %v547_v12, %v1653_v47  ;;  %v585_v16 = vmax.f32 %v544_v9, 0.0 }
 0x193   : > { %v586_v15 = vmax.f32 %v546_v11, 0.0 }
 0x194   : > { %v587_v17 = vmax.f32 %v548_v13, 0.0 }
 0x195   : > { %v604_v18 = vpack.c.bf16 %v586_v15, %v584_v14 }
 0x196   : > { %v605_v19 = vpack.c.bf16 %v587_v17, %v585_v16  ;;  %v551_v20 = vpop.f32.mrb[28].mxu0 }
 0x197   : > { %v552_v21 = vadd.f32 %v551_v20, %v1651_v46  ;;  %v553_v22 = vpop.f32.mrb[29].mxu0 }
 0x198   : > { %v554_v23 = vadd.f32 %v553_v22, %v1653_v47  ;;  %v555_v24 = vpop.f32.mrb[30].mxu0  ;;  %855 = vmatprep.mubr.bf16.mxu1 %v605_v19 }
 0x199   : > { %v556_v25 = vadd.f32 %v555_v24, %v1651_v46  ;;  %v557_v26 = vpop.f32.mrb[31].mxu0  ;;  %856 = vmatmul.mubr.bf16.gmra.mrb[24].mxu1 %v604_v18  ;;  %v588_v28 = vmax.f32 %v552_v21, 0.0 }
 0x19a   : > { %v558_v27 = vadd.f32 %v557_v26, %v1653_v47  ;;  %v589_v30 = vmax.f32 %v554_v23, 0.0 }
 0x19b   : > { %v590_v29 = vmax.f32 %v556_v25, 0.0 }
 0x19c   : > { %v591_v31 = vmax.f32 %v558_v27, 0.0 }
 0x19d   : > { %v606_v32 = vpack.c.bf16 %v590_v29, %v588_v28 }
 0x19e   : > { %v607_v33 = vpack.c.bf16 %v591_v31, %v589_v30 }
 0x1a0   : > { %863 = vmatprep.mubr.bf16.mxu1 %v607_v33 }
 0x1a1   : > { %864 = vmatmul.mubr.bf16.gmra.mrb[28].mxu1 %v606_v32 }
 0x23c   : > { %v1071_v34 = vpop.f32.mrb[0].mxu1 }
 0x23d   : > { %v1072_v46 = vpop.f32.mrb[1].mxu1 }
 0x23e   : > { %v1073_v36 = vadd.f32 %v1072_v46, %v1071_v34  ;;  %v1074_v37 = vpop.f32.mrb[2].mxu1 }
 0x23f   : > { %v1075_v38 = vpop.f32.mrb[3].mxu1 }
 0x240   : > { %v810_v47 = vadd.f32 %v1073_v36, %v1691_v35  ;;  %v1076_v39 = vadd.f32 %v1075_v38, %v1074_v37 }
 0x242   : > { %872 = vst [vmem:[%s1694_s28] sm:$0xff] %v810_v47  ;;  %v813_v40 = vadd.f32 %v1076_v39, %v1691_v35 }
 0x244   : > { %873 = vst [vmem:[%s1694_s28 + $0x8] sm:$0xff] %v813_v40  ;;  %v1077_v41 = vpop.f32.mrb[4].mxu1 }
 0x245   : > { %v1078_v42 = vpop.f32.mrb[5].mxu1 }
 0x246   : > { %v1079_v43 = vadd.f32 %v1078_v42, %v1077_v41  ;;  %v1080_v44 = vpop.f32.mrb[6].mxu1 }
 0x247   : > { %v1081_v45 = vpop.f32.mrb[7].mxu1 }
 0x248   : > { %v818_v48 = vadd.f32 %v1079_v43, %v1691_v35  ;;  %v1082_v49 = vadd.f32 %v1081_v45, %v1080_v44 }
 0x24a   : > { %874 = vst [vmem:[%s1694_s28 + $0x10] sm:$0xff] %v818_v48  ;;  %v821_v50 = vadd.f32 %v1082_v49, %v1691_v35 }
 0x24c   : > { %875 = vst [vmem:[%s1694_s28 + $0x18] sm:$0xff] %v821_v50  ;;  %v1083_v51 = vpop.f32.mrb[8].mxu1 }
 0x24d   : > { %v1084_v52 = vpop.f32.mrb[9].mxu1 }
 0x24e   : > { %v1085_v53 = vadd.f32 %v1084_v52, %v1083_v51  ;;  %v1086_v54 = vpop.f32.mrb[10].mxu1 }
 0x24f   : > { %v1087_v55 = vpop.f32.mrb[11].mxu1 }
 0x250   : > { %v826_v56 = vadd.f32 %v1085_v53, %v1691_v35  ;;  %v1088_v57 = vadd.f32 %v1087_v55, %v1086_v54 }
 0x252   : > { %876 = vst [vmem:[%s1694_s28 + $0x20] sm:$0xff] %v826_v56  ;;  %v829_v58 = vadd.f32 %v1088_v57, %v1691_v35 }
 0x254   : > { %877 = vst [vmem:[%s1694_s28 + $0x28] sm:$0xff] %v829_v58  ;;  %v1089_v59 = vpop.f32.mrb[12].mxu1 }
 0x255   : > { %v1090_v60 = vpop.f32.mrb[13].mxu1 }
 0x256   : > { %v1091_v61 = vadd.f32 %v1090_v60, %v1089_v59  ;;  %v1092_v62 = vpop.f32.mrb[14].mxu1 }
 0x257   : > { %v1093_v63 = vpop.f32.mrb[15].mxu1 }
 0x258   : > { %v834_v0 = vadd.f32 %v1091_v61, %v1691_v35  ;;  %v1094_v1 = vadd.f32 %v1093_v63, %v1092_v62 }
 0x25a   : > { %878 = vst [vmem:[%s1694_s28 + $0x30] sm:$0xff] %v834_v0  ;;  %v837_v2 = vadd.f32 %v1094_v1, %v1691_v35 }
 0x25c   : > { %879 = vst [vmem:[%s1694_s28 + $0x38] sm:$0xff] %v837_v2  ;;  %v1095_v3 = vpop.f32.mrb[16].mxu1 }
 0x25d   : > { %v1096_v4 = vpop.f32.mrb[17].mxu1 }
 0x25e   : > { %v1097_v5 = vadd.f32 %v1096_v4, %v1095_v3  ;;  %v1098_v6 = vpop.f32.mrb[18].mxu1 }
 0x25f   : > { %v1099_v7 = vpop.f32.mrb[19].mxu1 }
 0x260   : > { %v842_v8 = vadd.f32 %v1097_v5, %v1691_v35  ;;  %v1100_v9 = vadd.f32 %v1099_v7, %v1098_v6 }
 0x262   : > { %880 = vst [vmem:[%s1694_s28 + $0x40] sm:$0xff] %v842_v8  ;;  %v845_v10 = vadd.f32 %v1100_v9, %v1691_v35 }
 0x264   : > { %881 = vst [vmem:[%s1694_s28 + $0x48] sm:$0xff] %v845_v10  ;;  %v1101_v11 = vpop.f32.mrb[20].mxu1 }
 0x265   : > { %v1102_v12 = vpop.f32.mrb[21].mxu1 }
 0x266   : > { %v1103_v13 = vadd.f32 %v1102_v12, %v1101_v11  ;;  %v1104_v14 = vpop.f32.mrb[22].mxu1 }
 0x267   : > { %v1105_v15 = vpop.f32.mrb[23].mxu1 }
 0x268   : > { %v850_v16 = vadd.f32 %v1103_v13, %v1691_v35  ;;  %v1106_v17 = vadd.f32 %v1105_v15, %v1104_v14 }
 0x26a   : > { %882 = vst [vmem:[%s1694_s28 + $0x50] sm:$0xff] %v850_v16  ;;  %v853_v18 = vadd.f32 %v1106_v17, %v1691_v35 }
 0x26c   : > { %883 = vst [vmem:[%s1694_s28 + $0x58] sm:$0xff] %v853_v18  ;;  %v1107_v19 = vpop.f32.mrb[24].mxu1 }
 0x26d   : > { %v1108_v20 = vpop.f32.mrb[25].mxu1 }
 0x26e   : > { %v1109_v21 = vadd.f32 %v1108_v20, %v1107_v19  ;;  %v1110_v22 = vpop.f32.mrb[26].mxu1 }
 0x26f   : > { %v1111_v23 = vpop.f32.mrb[27].mxu1 }
 0x270   : > { %v858_v24 = vadd.f32 %v1109_v21, %v1691_v35  ;;  %v1112_v25 = vadd.f32 %v1111_v23, %v1110_v22 }
 0x272   : > { %884 = vst [vmem:[%s1694_s28 + $0x60] sm:$0xff] %v858_v24  ;;  %v861_v26 = vadd.f32 %v1112_v25, %v1691_v35 }
 0x274   : > { %885 = vst [vmem:[%s1694_s28 + $0x68] sm:$0xff] %v861_v26  ;;  %v1113_v27 = vpop.f32.mrb[28].mxu1 }
 0x275   : > { %v1114_v28 = vpop.f32.mrb[29].mxu1 }
 0x276   : > { %v1115_v29 = vadd.f32 %v1114_v28, %v1113_v27  ;;  %v1116_v30 = vpop.f32.mrb[30].mxu1 }
 0x277   : > { %v1117_v31 = vpop.f32.mrb[31].mxu1 }
 0x278   : > { %v866_v32 = vadd.f32 %v1115_v29, %v1691_v35  ;;  %v1118_v33 = vadd.f32 %v1117_v31, %v1116_v30 }
 0x27a   : > { %886 = vst [vmem:[%s1694_s28 + $0x70] sm:$0xff] %v866_v32  ;;  %v869_v34 = vadd.f32 %v1118_v33, %v1691_v35 }
 0x27c   : > { %887 = vst [vmem:[%s1694_s28 + $0x78] sm:$0xff] %v869_v34 }
 0x27d   : > { %1340 = shalt.err (!%p1337_p2)
}
 0x27e   : > { %s1341_s24 = scalar_lea.hbm %s1729_s23, 2048  ;;  %s1345_s13 = scalar_lea.hbm %s1783_s5, 4096 }
 0x27f   : > { %p1342_p13 = scmp.ne.s32.totalorder %s1729_s23, %s1341_s24  ;;  %p1346_p4 = scmp.lt.u32.totalorder %s1729_s23, %s1783_s5 }
 0x280   : > { %p1347_p7 = scmp.lt.u32.totalorder %s1345_s13, %s1341_s24  ;;  %p1349_p11 = scmp.lt.u32.totalorder %s1341_s24, %s1729_s23 }
 0x281   : > { %p1343_p6 = pnand %p1342_p13, %p1797_p0 }
 0x282   : > { %p1348_p8 = por %p1347_p7, %p1346_p4 }
 0x283   : > { %p1344_p10 = pneg %p1343_p6 }
 0x284   : > { %p1350_p1 = por %p1349_p11, %p1348_p8 }
 0x286   : > { %p1351_p3 = pnand %p1350_p1, %p1344_p10 }
 0x288   : > { %1354 = shalt.err (!%p1351_p3)
}
 0x289   : > { %s1408_s14 = smov 128   ;;  %s1409_s30 = smov 8  }
 0x28a   : > { %1129 = dma.vmem_to_hbm [thread:$0]  (%p1797_p0), %s1731_s15, 2048, %s1729_s23, %s889_s22, %s1408_s14, %s1408_s14, %s1409_s30  }
 0x28b PF: > { %s917_s11 = sand.u32 1, %s1385_s18   ;;  %p1798_p5 = scmp.ne.s32.totalorder %s1788_s25, 0 }
 0x28c   : > { %p1799_p9 = scmp.ge.s32.totalorder %s1397_s21, 2  ;;  %s918_s7 = scalar_lea.sflag [#allocation5], %s917_s11 }
 0x28e   : > { %p1143_p12 = pnand %p1799_p9, %p1798_p5 }
 0x290   : > { %1380 = dma.done.wait (!%p1143_p12), %s918_s7, 2048  }
 0x291   : > { %1382 = vsyncadd (!%p1143_p12), %s918_s7, 4294965248  ;;  %p19_p2 = scmp.ge.s32.totalorder %s1553_s16, 4   ;;  %s1800_s18 = smov %s1389_s19 }
 0x292   : > { %s1801_s19 = smov %s1393_s20  ;;  %s1802_s20 = smov %s1562_s27 }
 0x293   : > { %s1803_s21 = smov %s1553_s16  ;;  %21 = sbr.rel (!%p19_p2) target bundleno = 6 (0x6), region = 93 }
 0x29a   :  { %923 = vsyncpa [#allocation4], 1 }
 0x29b   :  { %925 = vsyncpa [#allocation4 + $0x1], 1 }
 0x29c   :  { %926 = vsyncpa [#allocation7], 1 }
 0x29d   :  { %927 = vsyncpa [#allocation5], 1 }
 0x29e   :  { %929 = vsyncpa [#allocation5 + $0x1], 1 }

</bundles_post_ra>
